<compile_context>
chip_gen: v7x
topology: tpu7x:2x2x1
jax: 0.10.0
libtpu: 0.0.40
codegen_flags: <defaults>
</compile_context>

<pallas_src>
import functools

import jax
import jax.numpy as jnp
from jax.experimental import pallas as pl
from jax.experimental.pallas import tpu as pltpu

_LANES = 128
_SUBLANES = 8
_ROW_ALIGN = 32          # multiple of 8 (f32), 16 (bf16), 32 (int8/fp8) tiles
_MAX_BLOCK_ROWS = 8192   # (8192, 128) f32 block = 4 MiB per input
_SMALL_B_CUTOFF = 16384  # below this, plain XLA beats kernel launch overhead
_NUM_SHARDS = 2          # leading "parallel" axis -> both TCs on v7x


def _jax_metrics(logit, target):
    d = logit.astype(jnp.float32) - target.astype(jnp.float32)
    mse = jnp.mean(d * d)
    return {
        "loss": mse,                    # nn.MSELoss(reduction='mean') == MSE
        "MSE": mse,
        "RMSE": jnp.sqrt(mse),
        "MAE": jnp.mean(jnp.abs(d)),
    }


def _lba_partial_sums_kernel(logit_ref, target_ref, out_ref,
                             acc_sq_ref, acc_abs_ref,
                             *, block_rows: int, blocks_per_shard: int,
                             rows_total: int):
    shard = pl.program_id(0)
    i = pl.program_id(1)

    @pl.when(i == 0)
    def _init():
        acc_sq_ref[...] = jnp.zeros_like(acc_sq_ref)
        acc_abs_ref[...] = jnp.zeros_like(acc_abs_ref)

    # Global (unclamped) row-block index -> number of valid rows in this block.
    # Rows past the array edge (ragged last block, or a clamped duplicate block
    # past the end of the grid) contain unspecified data and are masked out.
    global_block = shard * blocks_per_shard + i
    valid_rows = rows_total - global_block * block_rows
    row_ids = jax.lax.broadcasted_iota(jnp.int32, (block_rows, _LANES), 0)
    mask = row_ids < valid_rows

    x = logit_ref[...].astype(jnp.float32)
    y = target_ref[...].astype(jnp.float32)
    d = jnp.where(mask, x - y, 0.0)

    # Per-step: pure VPU elementwise adds into lane-resident (8,128) f32
    # accumulators; the single cross-lane XLU reduce happens once in finalize.
    d_sq = d * d
    d_ab = jnp.abs(d)
    if block_rows % _SUBLANES == 0:
        acc_sq_ref[...] += jnp.sum(d_sq.reshape(-1, _SUBLANES, _LANES), axis=0)
        acc_abs_ref[...] += jnp.sum(d_ab.reshape(-1, _SUBLANES, _LANES), axis=0)
    else:
        # Tiny-array path (block == full array with < 8 rows).
        acc_sq_ref[0:1, :] += jnp.sum(d_sq, axis=0, keepdims=True)
        acc_abs_ref[0:1, :] += jnp.sum(d_ab, axis=0, keepdims=True)

    @pl.when(i == pl.num_programs(1) - 1)
    def _finalize():
        out_ref[0, 0] = jnp.sum(acc_sq_ref[...])   # single XLU reduce
        out_ref[0, 1] = jnp.sum(acc_abs_ref[...])


def lba_criterion(logit: jax.Array, target: jax.Array, *,
                  max_block_rows: int = _MAX_BLOCK_ROWS,
                  small_b_cutoff: int = _SMALL_B_CUTOFF,
                  num_shards: int = _NUM_SHARDS):
    """Pallas implementation of LBACriterion.forward (training-mode metrics).

    logit, target: 1-D arrays of shape [B] (any B >= 1, any float dtype).
    Returns dict with 'loss', 'MSE', 'RMSE', 'MAE' float32 scalars.
    """
    assert logit.shape == target.shape and logit.ndim == 1
    n = logit.shape[0]
    assert n > 0

    # Tiny batches (the common LBA case): fixed pallas_call launch overhead
    # cannot beat a fused XLA reduction, so fall back.
    if n < small_b_cutoff:
        return _jax_metrics(logit, target)

    rows_total = pl.cdiv(n, _LANES)
    padded = rows_total * _LANES

    def to_slab(v):
        v = jnp.ravel(v)
        if padded != n:
            # Residual copy only when B is not 128-aligned; padded zeros in
            # BOTH inputs contribute d = 0 to both sums.
            v = jnp.pad(v, (0, padded - n))
        return v.reshape(rows_total, _LANES)   # free bitcast when no pad

    x2 = to_slab(logit)   # keep upstream dtype (e.g. bf16) in HBM; cast in-kernel
    y2 = to_slab(target)

    # Block rows: big (4 MiB f32/input) to amortize per-step overhead, multiple
    # of 32 (covers all dtype tilings), never larger than the array itself.
    if rows_total <= _ROW_ALIGN:
        block_rows = rows_total                      # single full-array block
    else:
        block_rows = min(max_block_rows,
                         (rows_total // _ROW_ALIGN) * _ROW_ALIGN)
    num_blocks = pl.cdiv(rows_total, block_rows)
    shards = max(1, min(int(num_shards), int(num_blocks)))
    blocks_per_shard = pl.cdiv(num_blocks, shards)
    last_block = num_blocks - 1

    def in_map(s, i):
        # Clamp so a shard's overshoot steps never issue an OOB DMA; the kernel
        # masks those steps (valid_rows <= 0) so they contribute nothing.
        return (jnp.minimum(s * blocks_per_shard + i, last_block), 0)

    block_bytes = block_rows * _LANES * x2.dtype.itemsize
    # 2 inputs x 2 pipeline buffers + headroom; explicit limit is mandatory on
    # v5e (16 MiB scoped default) and keeps v7x (64 MiB physical) safe.
    vmem_limit = int(2 * 2 * block_bytes + (8 << 20))

    kernel = functools.partial(
        _lba_partial_sums_kernel,
        block_rows=block_rows,
        blocks_per_shard=int(blocks_per_shard),
        rows_total=int(rows_total),
    )

    partials = pl.pallas_call(
        kernel,
        out_shape=jax.ShapeDtypeStruct((shards, 2), jnp.float32),
        grid=(shards, int(blocks_per_shard)),
        in_specs=[
            pl.BlockSpec((block_rows, _LANES), in_map),
            pl.BlockSpec((block_rows, _LANES), in_map),
        ],
        out_specs=pl.BlockSpec((1, 2), lambda s, i: (s, 0),
                               memory_space=pltpu.MemorySpace.SMEM),
        scratch_shapes=[
            pltpu.VMEM((_SUBLANES, _LANES), jnp.float32),
            pltpu.VMEM((_SUBLANES, _LANES), jnp.float32),
        ],
        compiler_params=pltpu.CompilerParams(
            dimension_semantics=("parallel", "arbitrary"),
            vmem_limit_bytes=vmem_limit,
        ),
        cost_estimate=pl.CostEstimate(
            flops=5 * n,
            transcendentals=0,
            bytes_accessed=2 * n * x2.dtype.itemsize,
        ),
    )(x2, y2)

    # Cross-shard combine + normalize: 4 scalar XLA ops.
    sum_sq = jnp.sum(partials[:, 0])
    sum_abs = jnp.sum(partials[:, 1])
    inv_n = jnp.float32(1.0 / n)          # global 1/N (true, unpadded count)
    mse = sum_sq * inv_n
    return {
        "loss": mse,
        "MSE": mse,
        "RMSE": jnp.sqrt(mse),
        "MAE": sum_abs * inv_n,
    }


def _check(result, ref):
    for name in ("loss", "MSE", "RMSE", "MAE"):
        assert jnp.allclose(result[name], ref[name], rtol=1e-5, atol=1e-6), (
            name, result[name], ref[name])


if __name__ == "__main__":
    key = jax.random.PRNGKey(0)
    k1, k2, k3, k4, k5, k6 = jax.random.split(key, 6)

    # Case 1: small batch typical of the LBA regression head, forced through
    # the Pallas kernel path (single full-array block, tiny-row branch).
    batch = 256
    logit = jax.random.normal(k1, (batch,), dtype=jnp.float32)
    target = jax.random.normal(k2, (batch,), dtype=jnp.float32)
    result = lba_criterion(logit, target, small_b_cutoff=0)
    jax.block_until_ready(result)
    _check(result, _jax_metrics(logit, target))

    # Case 2: non-multiple-of-128 batch with a small block to exercise the
    # multi-block accumulation, two-shard parallel axis, ragged-row masking
    # and the clamped overshoot block.
    batch2 = 70000
    logit2 = jax.random.normal(k3, (batch2,), dtype=jnp.float32)
    target2 = jax.random.normal(k4, (batch2,), dtype=jnp.float32)
    result2 = lba_criterion(logit2, target2, max_block_rows=64,
                            small_b_cutoff=0)
    jax.block_until_ready(result2)
    _check(result2, _jax_metrics(logit2, target2))

    # Case 3: default small-B fallback path (plain fused XLA reduction).
    batch3 = 300
    logit3 = jax.random.normal(k5, (batch3,), dtype=jnp.float32)
    target3 = jax.random.normal(k6, (batch3,), dtype=jnp.float32)
    result3 = lba_criterion(logit3, target3)
    jax.block_until_ready(result3)
    _check(result3, _jax_metrics(logit3, target3))

    print("KERNEL_OK")
</pallas_src>

<mosaic_0001>
module attributes {stable_mosaic.version = 11 : i64} {
  func.func @_lba_partial_sums_kernel(%arg0: i32, %arg1: i32, %arg2: memref<2x128xf32, #tpu.memory_space<vmem>>, %arg3: memref<2x128xf32, #tpu.memory_space<vmem>>, %arg4: memref<1x2xf32, #tpu.memory_space<smem>>, %arg5: memref<8x128xf32, #tpu.memory_space<vmem>>, %arg6: memref<8x128xf32, #tpu.memory_space<vmem>>) attributes {dimension_semantics = [#tpu.dimension_semantics<parallel>, #tpu.dimension_semantics<arbitrary>], iteration_bounds = array<i64: 1, 1>, scalar_prefetch = 0 : i64, scratch_operands = 2 : i64, tpu.core_type = #tpu.core_type<tc>, window_params = [{transform_indices = @transform_0, window_bounds = array<i64: 2, 128>}, {transform_indices = @transform_1, window_bounds = array<i64: 2, 128>}, {transform_indices = @transform_2, window_bounds = array<i64: 1, 2>}]} {
    %c0_i32 = arith.constant 0 : i32
    %0 = arith.cmpi eq, %arg1, %c0_i32 : i32
    %1 = arith.extui %0 : i1 to i32
    %c0_i32_0 = arith.constant 0 : i32
    %2 = arith.cmpi ne, %1, %c0_i32_0 : i32
    scf.if %2 {
      %cst_17 = arith.constant 0.000000e+00 : f32
      %30 = vector.broadcast %cst_17 : f32 to vector<8x128xf32>
      %c0_18 = arith.constant 0 : index
      %c0_19 = arith.constant 0 : index
      %31 = vector.load %arg5[%c0_18, %c0_19] : memref<8x128xf32, #tpu.memory_space<vmem>>, vector<8x128xf32>
      tpu.vector_store %arg5[%c0_18, %c0_19], %30 {strides = array<i32>} : memref<8x128xf32, #tpu.memory_space<vmem>>, vector<8x128xf32>,
      %cst_20 = arith.constant 0.000000e+00 : f32
      %32 = vector.broadcast %cst_20 : f32 to vector<8x128xf32>
      %c0_21 = arith.constant 0 : index
      %c0_22 = arith.constant 0 : index
      %33 = vector.load %arg6[%c0_21, %c0_22] : memref<8x128xf32, #tpu.memory_space<vmem>>, vector<8x128xf32>
      tpu.vector_store %arg6[%c0_21, %c0_22], %32 {strides = array<i32>} : memref<8x128xf32, #tpu.memory_space<vmem>>, vector<8x128xf32>,
    } else {
    }
    %c1_i32 = arith.constant 1 : i32
    %3 = arith.muli %arg0, %c1_i32 : i32
    %4 = arith.addi %3, %arg1 : i32
    %c2_i32 = arith.constant 2 : i32
    %5 = arith.muli %4, %c2_i32 : i32
    %c2_i32_1 = arith.constant 2 : i32
    %6 = arith.subi %c2_i32_1, %5 : i32
    %7 = tpu.iota {dimensions = array<i32: 0>} : vector<2x128xi32>
    %8 = vector.broadcast %6 : i32 to vector<2x128xi32>
    %9 = arith.cmpi slt, %7, %8 : vector<2x128xi32>
    %c0 = arith.constant 0 : index
    %c0_2 = arith.constant 0 : index
    %10 = vector.load %arg2[%c0, %c0_2] : memref<2x128xf32, #tpu.memory_space<vmem>>, vector<2x128xf32>
    %c0_3 = arith.constant 0 : index
    %c0_4 = arith.constant 0 : index
    %11 = vector.load %arg3[%c0_3, %c0_4] : memref<2x128xf32, #tpu.memory_space<vmem>>, vector<2x128xf32>
    %12 = arith.subf %10, %11 : vector<2x128xf32>
    %cst = arith.constant 0.000000e+00 : f32
    %13 = vector.broadcast %cst : f32 to vector<2x128xf32>
    %14 = arith.select %9, %12, %13 : vector<2x128xi1>, vector<2x128xf32>
    %15 = arith.mulf %14, %14 : vector<2x128xf32>
    %16 = math.absf %14 : vector<2x128xf32>
    %c0_5 = arith.constant 0 : index
    %c0_6 = arith.constant 0 : index
    %17 = vector.load %arg5[%c0_5, %c0_6] : memref<8x128xf32, #tpu.memory_space<vmem>>, vector<1x128xf32>
    %cst_7 = arith.constant dense<0.000000e+00> : vector<128xf32>
    %18 = vector.multi_reduction <add>, %15, %cst_7 [0] : vector<2x128xf32> to vector<128xf32>
    %19 = vector.shape_cast %18 : vector<128xf32> to vector<1x128xf32>
    %20 = arith.addf %17, %19 : vector<1x128xf32>
    %c0_8 = arith.constant 0 : index
    %c0_9 = arith.constant 0 : index
    %21 = vector.load %arg5[%c0_8, %c0_9] : memref<8x128xf32, #tpu.memory_space<vmem>>, vector<1x128xf32>
    tpu.vector_store %arg5[%c0_8, %c0_9], %20 {strides = array<i32>} : memref<8x128xf32, #tpu.memory_space<vmem>>, vector<1x128xf32>,
    %c0_10 = arith.constant 0 : index
    %c0_11 = arith.constant 0 : index
    %22 = vector.load %arg6[%c0_10, %c0_11] : memref<8x128xf32, #tpu.memory_space<vmem>>, vector<1x128xf32>
    %cst_12 = arith.constant dense<0.000000e+00> : vector<128xf32>
    %23 = vector.multi_reduction <add>, %16, %cst_12 [0] : vector<2x128xf32> to vector<128xf32>
    %24 = vector.shape_cast %23 : vector<128xf32> to vector<1x128xf32>
    %25 = arith.addf %22, %24 : vector<1x128xf32>
    %c0_13 = arith.constant 0 : index
    %c0_14 = arith.constant 0 : index
    %26 = vector.load %arg6[%c0_13, %c0_14] : memref<8x128xf32, #tpu.memory_space<vmem>>, vector<1x128xf32>
    tpu.vector_store %arg6[%c0_13, %c0_14], %25 {strides = array<i32>} : memref<8x128xf32, #tpu.memory_space<vmem>>, vector<1x128xf32>,
    %c0_i32_15 = arith.constant 0 : i32
    %27 = arith.cmpi eq, %arg1, %c0_i32_15 : i32
    %28 = arith.extui %27 : i1 to i32
    %c0_i32_16 = arith.constant 0 : i32
    %29 = arith.cmpi ne, %28, %c0_i32_16 : i32
    scf.if %29 {
      %c0_17 = arith.constant 0 : index
      %c0_18 = arith.constant 0 : index
      %30 = vector.load %arg5[%c0_17, %c0_18] : memref<8x128xf32, #tpu.memory_space<vmem>>, vector<8x128xf32>
      %31 = vector.shape_cast %30 : vector<8x128xf32> to vector<1x8x128xf32>
      %cst_19 = arith.constant dense<0.000000e+00> : vector<1xf32>
      %32 = vector.multi_reduction <add>, %31, %cst_19 [1, 2] : vector<1x8x128xf32> to vector<1xf32>
      %33 = vector.shape_cast %32 : vector<1xf32> to vector<1x1x1xf32>
      %34 = vector.extract %33[0, 0, 0] : f32 from vector<1x1x1xf32>
      %c0_20 = arith.constant 0 : index
      %c0_21 = arith.constant 0 : index
      %35 = memref.load %arg4[%c0_20, %c0_21] : memref<1x2xf32, #tpu.memory_space<smem>>
      memref.store %34, %arg4[%c0_20, %c0_21] : memref<1x2xf32, #tpu.memory_space<smem>>
      %c0_22 = arith.constant 0 : index
      %c0_23 = arith.constant 0 : index
      %36 = vector.load %arg6[%c0_22, %c0_23] : memref<8x128xf32, #tpu.memory_space<vmem>>, vector<8x128xf32>
      %37 = vector.shape_cast %36 : vector<8x128xf32> to vector<1x8x128xf32>
      %cst_24 = arith.constant dense<0.000000e+00> : vector<1xf32>
      %38 = vector.multi_reduction <add>, %37, %cst_24 [1, 2] : vector<1x8x128xf32> to vector<1xf32>
      %39 = vector.shape_cast %38 : vector<1xf32> to vector<1x1x1xf32>
      %40 = vector.extract %39[0, 0, 0] : f32 from vector<1x1x1xf32>
      %c0_25 = arith.constant 0 : index
      %c1 = arith.constant 1 : index
      %41 = memref.load %arg4[%c0_25, %c1] : memref<1x2xf32, #tpu.memory_space<smem>>
      memref.store %40, %arg4[%c0_25, %c1] : memref<1x2xf32, #tpu.memory_space<smem>>
    } else {
    }
    return
  }
  func.func @transform_0(%arg0: i32, %arg1: i32) -> (i32, i32) {
    %c1_i32 = arith.constant 1 : i32
    %0 = arith.muli %arg0, %c1_i32 : i32
    %1 = arith.addi %0, %arg1 : i32
    %c0_i32 = arith.constant 0 : i32
    %2 = arith.minsi %1, %c0_i32 : i32
    %c0_i32_0 = arith.constant 0 : i32
    %c0_i32_1 = arith.constant 0 : i32
    return %2, %c0_i32_0 : i32, i32
  }
  func.func @transform_1(%arg0: i32, %arg1: i32) -> (i32, i32) {
    %c1_i32 = arith.constant 1 : i32
    %0 = arith.muli %arg0, %c1_i32 : i32
    %1 = arith.addi %0, %arg1 : i32
    %c0_i32 = arith.constant 0 : i32
    %2 = arith.minsi %1, %c0_i32 : i32
    %c0_i32_0 = arith.constant 0 : i32
    %c0_i32_1 = arith.constant 0 : i32
    return %2, %c0_i32_0 : i32, i32
  }
  func.func @transform_2(%arg0: i32, %arg1: i32) -> (i32, i32) {
    %c0_i32 = arith.constant 0 : i32
    %c0_i32_0 = arith.constant 0 : i32
    return %arg0, %c0_i32 : i32, i32
  }
}

</mosaic_0001>

<bundles_post_ra>
// kernel: tpu_custom_call.1
= control target key start
LH: loop header
LB: loop body
LE: loop exit
PB: predicated region body
PF: predicated region fallthrough
CT: control target
= control target key end

     0   :  { %7 = vsyncpa [#allocation5], 0  ;;  %s236_s0 = inlined_call_operand.hbm [shape: f32[2,128], index: 0, kind: input, shape index: {}]   ;;  %s237_s1 = inlined_call_operand.vmem [shape: f32[2,128], index: 1, kind: input, shape index: {}]   ;;  %s238_s2 = inlined_call_operand.hbm [shape: f32[1,2], index: 2, kind: output, shape index: {}]  }
   0x1   :  { %8 = vsyncpa [#allocation6], 0  ;;  %s191_s9 = smov [#allocation4]   ;;  %s155_s13 = scalar_lea.hbm %s236_s0, 32 }
   0x2   :  { %s20_s10 = sshll.u32 %s191_s9, 4  ;;  %p156_p0 = scmp.ne.s32.totalorder %s236_s0, %s155_s13  ;;  %s21_s10 = int_to_ptr.vmem [resolvable:$true] %s20_s10 }
   0x3   :  { %p159_p1 = scmp.lt.u32.totalorder %s155_s13, %s236_s0 }
   0x5   :  { %p161_p2 = pnand %p159_p1, %p156_p0 }
   0x7   :  { %164 = shalt.err (!%p161_p2)
}
   0x8   :  { %s165_s18 = scalar_lea.vmem %s21_s10, 32  ;;  %p170_p4 = scmp.lt.s32.totalorder %s21_s10, %s21_s10 }
   0x9   :  { %p166_p3 = scmp.ne.s32.totalorder %s21_s10, %s165_s18  ;;  %p171_p5 = scmp.lt.s32.totalorder %s165_s18, %s165_s18 }
   0xb   :  { %p172_p6 = por %p171_p5, %p170_p4 }
   0xd   :  { %p173_p7 = pnand %p172_p6, %p166_p3 }
   0xf   :  { %176 = shalt.err (!%p173_p7)
}
  0x10   :  { %23 = dma.hbm_to_vmem [thread:$0]  %s236_s0, 32, %s21_s10, [#allocation5]  }
  0x11   :  { %187 = dma.done.wait [#allocation5], 32  }
  0x12   :  { %188 = vsyncadd [#allocation5], 4294967264  ;;  %v68_v0 = vlaneseq  ;;  %v192_v1 = vmov 0.0   ;;  %v72_v3 = vld [vmem:[#allocation4] sm:$0x3]  ;;  %vm79_vm1 = vcmask 1041408  }
  0x13   :  { %63 = vst [vmem:[#allocation2] sm:$0xff] %v192_v1  ;;  %64 = vst [vmem:[#allocation3] sm:$0xff] %v192_v1  ;;  %v73_v4 = vld [vmem:[%s237_s1] sm:$0x3]  ;;  %s177_s25 = scalar_lea.hbm %s238_s2, 16 }
  0x14   :  { %v69_v2 = vshrl.u32 %v68_v0, 7  ;;  %v74_v5 = vsub.f32 %v72_v3, %v73_v4  ;;  %p178_p8 = scmp.ne.s32.totalorder %s238_s2, %s177_s25  ;;  %p181_p9 = scmp.lt.u32.totalorder %s177_s25, %s238_s2 }
  0x16   :  { %vm71_vm0 = vcmp.lt.s32.totalorder %v69_v2, 2  ;;  %p183_p10 = pnand %p181_p9, %p178_p8 }
  0x17   :  { %v75_v6 = vsel %vm71_vm0, %v74_v5, 0.0 }
  0x18   :  { %v76_v7 = vmul.f32 %v75_v6, %v75_v6  ;;  %v77_v8 = vand.u32 2147483647, %v75_v6 }
  0x1a   :  { %v80_v9 = vsel %vm79_vm1, %v76_v7, 0.0  ;;  %v90_v10 = vsel %vm79_vm1, %v77_v8, 0.0  ;;  %v78_v21 = vld [vmem:[#allocation2] sm:$0x1]  ;;  %v89_v22 = vld [vmem:[#allocation3] sm:$0x1] }
  0x1b   :  { %v81_v11 = vrot.slane %v80_v9, 4  ;;  %v91_v12 = vrot.slane %v90_v10, 4 }
  0x1d   :  { %v82_v13 = vadd.f32 %v81_v11, %v80_v9  ;;  %v92_v14 = vadd.f32 %v91_v12, %v90_v10 }
  0x1f   :  { %v83_v15 = vrot.slane %v82_v13, 2  ;;  %v93_v16 = vrot.slane %v92_v14, 2 }
  0x21   :  { %v84_v17 = vadd.f32 %v83_v15, %v82_v13  ;;  %v94_v18 = vadd.f32 %v93_v16, %v92_v14 }
  0x23   :  { %v85_v19 = vrot.slane %v84_v17, 1  ;;  %v95_v20 = vrot.slane %v94_v18, 1 }
  0x25   :  { %v86_v23 = vadd.f32 %v85_v19, %v84_v17  ;;  %v96_v24 = vadd.f32 %v95_v20, %v94_v18 }
  0x27   :  { %v87_v25 = vadd.f32 %v86_v23, %v78_v21  ;;  %v97_v26 = vadd.f32 %v96_v24, %v89_v22 }
  0x29   :  { %88 = vst [vmem:[#allocation2] sm:$0x1] %v87_v25  ;;  %98 = vst [vmem:[#allocation3] sm:$0x1] %v97_v26 }
  0x30   :  { %v102_v27 = vld [vmem:[#allocation2] sm:$0xff]  ;;  %v114_v28 = vld [vmem:[#allocation3] sm:$0xff] }
  0x31   :  { %103 = vadd.xlane.f32.xlu0 %v102_v27 }
  0x35   :  { %115 = vadd.xlane.f32.xlu0 %v114_v28 }
  0xbe   :  { %v104_v29 = vpop.xlane.xlu0 %103 }
  0xbf   :  { %v105_v30 = vrot.slane %v104_v29, 4 }
  0xc1   :  { %v106_v31 = vadd.f32 %v105_v30, %v104_v29 }
  0xc2   :  { %v116_v32 = vpop.xlane.xlu0 %115 }
  0xc3   :  { %v107_v33 = vrot.slane %v106_v31, 2  ;;  %v117_v34 = vrot.slane %v116_v32, 4 }
  0xc5   :  { %v118_v35 = vadd.f32 %v117_v34, %v116_v32  ;;  %v108_v36 = vadd.f32 %v107_v33, %v106_v31 }
  0xc7   :  { %v119_v37 = vrot.slane %v118_v35, 2  ;;  %v109_v38 = vrot.slane %v108_v36, 1 }
  0xc9   :  { %v120_v39 = vadd.f32 %v119_v37, %v118_v35  ;;  %v110_v40 = vadd.f32 %v109_v38, %v108_v36 }
  0xcb   :  { %148 = vpush %v110_v40  ;;  %v121_v41 = vrot.slane %v120_v39, 1 }
  0xcd   :  { %v122_v42 = vadd.f32 %v121_v41, %v120_v39 }
  0xcf   :  { %150 = vpush %v122_v42 }
  0xfc   :  { %s149_s0 = spop %148 }
  0xfd   :  { %113 = sst [smem:[#allocation7]] %s149_s0 }
 0x100   :  { %s151_s1 = spop %150 }
 0x101   :  { %125 = sst [smem:[#allocation7 + $0x1]] %s151_s1 }
 0x102   :  { %186 = shalt.err (!%p183_p10)
}
 0x103   :  { %s193_s30 = smov [#allocation7]  }
 0x104   :  { %133 = dma.smem_to_hbm %s193_s30, 16, %s238_s2, [#allocation6]  }
 0x105   :  { %189 = dma.done.wait [#allocation6], 16  }
 0x106   :  { %190 = vsyncadd [#allocation6], 4294967280 }
 0x107   :  { %137 = sfence }
 0x108   :  { %138 = vsyncpa [#allocation5], 1 }
 0x109   :  { %139 = vsyncpa [#allocation6], 1 }

</bundles_post_ra>
